<compile_context>
chip_gen: v5e
topology: v5e:2x2
jax: 0.10.0
libtpu: 0.0.40
codegen_flags: <defaults>
</compile_context>

<pallas_src>
import functools

import jax
import jax.numpy as jnp
from jax.experimental import pallas as pl
from jax.experimental.pallas import tpu as pltpu

DROP_OUT = 0.5
LANE = 128


def _round_up(x: int, m: int) -> int:
    return (x + m - 1) // m * m


def _uniform_u32(shape, row_offset_u32, seed_u32, salt: int):
    """Counter-based (splitmix32-style) uniform uint32 bits per element.

    Pure jnp integer ops -> lowers on TPU (VPU) and in interpret mode alike.
    Counter = global (row, col) element index, so the dropout mask does not
    depend on how the batch is tiled across the grid.
    """
    r = jax.lax.broadcasted_iota(jnp.int32, shape, 0).astype(jnp.uint32) + row_offset_u32
    c = jax.lax.broadcasted_iota(jnp.int32, shape, 1).astype(jnp.uint32)
    x = r * jnp.uint32(shape[1]) + c
    x = x + seed_u32 * jnp.uint32(0x9E3779B9) + jnp.uint32(salt) * jnp.uint32(0x85EBCA6B)
    x = (x ^ (x >> 16)) * jnp.uint32(0x7FEB352D)
    x = (x ^ (x >> 15)) * jnp.uint32(0x846CA68B)
    return x ^ (x >> 16)


def _dropout(h, bits, p: float):
    """Matches reference: keep iff u > p, scale kept values by 1/(1-p).

    Cheap form: compare raw uint32 bits to a uint32 threshold; single select +
    multiply (no shift / int->float convert on the VALU path).
    """
    thresh = jnp.uint32(min(int(p * 4294967296.0), 4294967295))
    keep = bits > thresh
    return jnp.where(keep, h * (1.0 / (1.0 - p)), 0.0)


def mlp_kernel(seed_ref, x_ref, w1_ref, b1_ref, w2_ref, b2_ref, w3_ref, b3_ref,
               o_ref, *, training: bool, tile_b: int, drop_p: float):
    # Contract x's last dim with W's last dim (torch (out, in) layout):
    # y = x @ W^T, exactly like nn.Linear.
    dn = (((1,), (1,)), ((), ()))

    if training:
        seed_u32 = seed_ref[0].astype(jnp.uint32)
        row0 = (pl.program_id(0) * tile_b).astype(jnp.uint32)

    # ---- lin1 + ReLU (+ dropout) ----  bf16 operands, f32 accumulation.
    h1 = jax.lax.dot_general(x_ref[...], w1_ref[...], dn,
                             preferred_element_type=jnp.float32)
    h1 = jnp.maximum(h1 + b1_ref[...], 0.0)
    if training:
        h1 = _dropout(h1, _uniform_u32(h1.shape, row0, seed_u32, salt=1), drop_p)

    # ---- lin2 + ReLU (+ dropout) ----
    h2 = jax.lax.dot_general(h1.astype(jnp.bfloat16), w2_ref[...], dn,
                             preferred_element_type=jnp.float32)
    h2 = jnp.maximum(h2 + b2_ref[...], 0.0)
    if training:
        h2 = _dropout(h2, _uniform_u32(h2.shape, row0, seed_u32, salt=2), drop_p)

    # ---- lin3 ----
    out = jax.lax.dot_general(h2.astype(jnp.bfloat16), w3_ref[...], dn,
                              preferred_element_type=jnp.float32)
    o_ref[...] = (out + b3_ref[...]).astype(o_ref.dtype)


def net_forward(x, params, seed, *, num_inputs: int, is_training: bool = True,
                max_tile_b: int = 256):
    """params = (w1, b1, w2, b2, w3, b3) with torch-style weight shapes (out, in)."""
    w1, b1, w2, b2, w3, b3 = params
    x2d = x.reshape(-1, num_inputs)
    B = x2d.shape[0]
    H1, K = w1.shape
    H2 = w2.shape[0]
    O = w3.shape[0]
    assert K == num_inputs

    # Lane-dense padded feature dims (multiples of 128); batch tile multiple of 8.
    Kp, H1p, H2p, Op = (_round_up(d, LANE) for d in (K, H1, H2, O))
    tile_b = min(max_tile_b, _round_up(B, 8))
    Bp = _round_up(B, tile_b)

    # Pad + cast: bf16 MXU operands (halves HBM/VMEM traffic), f32 biases.
    # Zero padding keeps results exact: padded rows/cols of W contribute 0.
    xp = jnp.pad(x2d.astype(jnp.bfloat16), ((0, Bp - B), (0, Kp - K)))
    w1p = jnp.pad(w1.astype(jnp.bfloat16), ((0, H1p - H1), (0, Kp - K)))
    w2p = jnp.pad(w2.astype(jnp.bfloat16), ((0, H2p - H2), (0, H1p - H1)))
    w3p = jnp.pad(w3.astype(jnp.bfloat16), ((0, Op - O), (0, H2p - H2)))
    b1p = jnp.pad(b1.astype(jnp.float32), (0, H1p - H1)).reshape(1, H1p)
    b2p = jnp.pad(b2.astype(jnp.float32), (0, H2p - H2)).reshape(1, H2p)
    b3p = jnp.pad(b3.astype(jnp.float32), (0, Op - O)).reshape(1, Op)

    seed_arr = jnp.asarray([seed], dtype=jnp.int32)
    grid = (Bp // tile_b,)

    kernel = functools.partial(mlp_kernel, training=is_training,
                               tile_b=tile_b, drop_p=DROP_OUT)

    out = pl.pallas_call(
        kernel,
        out_shape=jax.ShapeDtypeStruct((Bp, Op), jnp.float32),
        grid_spec=pltpu.PrefetchScalarGridSpec(
            num_scalar_prefetch=1,           # seed -> SMEM
            grid=grid,
            in_specs=[
                pl.BlockSpec((tile_b, Kp), lambda i, s: (i, 0)),   # x tile (streamed)
                pl.BlockSpec((H1p, Kp), lambda i, s: (0, 0)),      # w1 (resident)
                pl.BlockSpec((1, H1p), lambda i, s: (0, 0)),       # b1
                pl.BlockSpec((H2p, H1p), lambda i, s: (0, 0)),     # w2
                pl.BlockSpec((1, H2p), lambda i, s: (0, 0)),       # b2
                pl.BlockSpec((Op, H2p), lambda i, s: (0, 0)),      # w3
                pl.BlockSpec((1, Op), lambda i, s: (0, 0)),        # b3
            ],
            out_specs=pl.BlockSpec((tile_b, Op), lambda i, s: (i, 0)),
        ),
        compiler_params=pltpu.CompilerParams(
            dimension_semantics=("parallel",),   # 2 TCs on v7x share the batch axis
        ),
    )(seed_arr, xp, w1p, b1p, w2p, b2p, w3p, b3p)

    return out[:B, :O]


def init_params(key, num_inputs, num_outputs, num_hiddens1, num_hiddens2):
    """Deterministic torch-like Linear init: U(-1/sqrt(fan_in), 1/sqrt(fan_in))."""
    ks = jax.random.split(key, 6)

    def lin(kw, kb, fan_in, fan_out):
        bound = 1.0 / jnp.sqrt(fan_in)
        w = jax.random.uniform(kw, (fan_out, fan_in), jnp.float32, -bound, bound)
        b = jax.random.uniform(kb, (fan_out,), jnp.float32, -bound, bound)
        return w, b

    w1, b1 = lin(ks[0], ks[1], num_inputs, num_hiddens1)
    w2, b2 = lin(ks[2], ks[3], num_hiddens1, num_hiddens2)
    w3, b3 = lin(ks[4], ks[5], num_hiddens2, num_outputs)
    return (w1, b1, w2, b2, w3, b3)


if __name__ == "__main__":
    # Small shapes consistent with the module: input flattens to num_inputs.
    B, C, H, W = 8, 4, 4, 4
    num_inputs = C * H * W          # 64
    num_hiddens1 = 32
    num_hiddens2 = 32
    num_outputs = 16

    key = jax.random.PRNGKey(0)
    kx, kp = jax.random.split(key)
    x = jax.random.normal(kx, (B, C, H, W), jnp.float32)
    params = init_params(kp, num_inputs, num_outputs, num_hiddens1, num_hiddens2)

    # Training path (with dropout).
    out = net_forward(x, params, seed=1234, num_inputs=num_inputs, is_training=True)
    out = jax.block_until_ready(out)
    assert out.shape == (B, num_outputs), out.shape
    assert jnp.all(jnp.isfinite(out))

    # Eval path (no dropout) -- check against a plain-JAX reference.
    out_eval = jax.block_until_ready(
        net_forward(x, params, seed=0, num_inputs=num_inputs, is_training=False))
    assert out_eval.shape == (B, num_outputs)
    assert jnp.all(jnp.isfinite(out_eval))

    def ref_eval(x2d, ps):
        w1, b1, w2, b2, w3, b3 = ps
        h1 = jnp.maximum(x2d @ w1.T + b1, 0.0)
        h2 = jnp.maximum(h1 @ w2.T + b2, 0.0)
        return h2 @ w3.T + b3

    ref = ref_eval(x.reshape(-1, num_inputs), params)
    assert jnp.allclose(out_eval, ref, atol=5e-2, rtol=5e-2), \
        float(jnp.max(jnp.abs(out_eval - ref)))

    print("KERNEL_OK")
</pallas_src>

<mosaic_0001>
module attributes {stable_mosaic.version = 11 : i64} {
  func.func @mlp_kernel(%arg0: i32, %arg1: memref<1xi32, #tpu.memory_space<smem>>, %arg2: memref<8x128xbf16, #tpu.memory_space<vmem>>, %arg3: memref<128x128xbf16, #tpu.memory_space<vmem>>, %arg4: memref<1x128xf32, #tpu.memory_space<vmem>>, %arg5: memref<128x128xbf16, #tpu.memory_space<vmem>>, %arg6: memref<1x128xf32, #tpu.memory_space<vmem>>, %arg7: memref<128x128xbf16, #tpu.memory_space<vmem>>, %arg8: memref<1x128xf32, #tpu.memory_space<vmem>>, %arg9: memref<8x128xf32, #tpu.memory_space<vmem>>) attributes {dimension_semantics = [#tpu.dimension_semantics<parallel>], iteration_bounds = array<i64: 1>, scalar_prefetch = 1 : i64, scratch_operands = 0 : i64, tpu.core_type = #tpu.core_type<tc>, window_params = [{transform_indices = @transform_0, window_bounds = array<i64: 8, 128>}, {pipeline_mode = #tpu.pipeline_mode<synchronous>, transform_indices = @transform_1, window_bounds = array<i64: 128, 128>}, {pipeline_mode = #tpu.pipeline_mode<synchronous>, transform_indices = @transform_2, window_bounds = array<i64: 1, 128>}, {pipeline_mode = #tpu.pipeline_mode<synchronous>, transform_indices = @transform_3, window_bounds = array<i64: 128, 128>}, {pipeline_mode = #tpu.pipeline_mode<synchronous>, transform_indices = @transform_4, window_bounds = array<i64: 1, 128>}, {pipeline_mode = #tpu.pipeline_mode<synchronous>, transform_indices = @transform_5, window_bounds = array<i64: 128, 128>}, {pipeline_mode = #tpu.pipeline_mode<synchronous>, transform_indices = @transform_6, window_bounds = array<i64: 1, 128>}, {transform_indices = @transform_7, window_bounds = array<i64: 8, 128>}]} {
    %c0 = arith.constant 0 : index
    %0 = memref.load %arg1[%c0] : memref<1xi32, #tpu.memory_space<smem>>
    %c8_i32 = arith.constant 8 : i32
    %1 = arith.muli %arg0, %c8_i32 : i32
    %c0_0 = arith.constant 0 : index
    %c0_1 = arith.constant 0 : index
    %2 = vector.load %arg2[%c0_0, %c0_1] : memref<8x128xbf16, #tpu.memory_space<vmem>>, vector<8x128xbf16>
    %c0_2 = arith.constant 0 : index
    %c0_3 = arith.constant 0 : index
    %3 = vector.load %arg3[%c0_2, %c0_3] : memref<128x128xbf16, #tpu.memory_space<vmem>>, vector<128x128xbf16>
    %cst = arith.constant dense<0.000000e+00> : vector<8x128xf32>
    %4 = tpu.matmul %2, %3, %cst {dimension_numbers = #tpu.dot_dimension_numbers<[1], [1], [0], [0], [0, 0, 1, 0], [], []>} : vector<8x128xbf16>, vector<128x128xbf16>, vector<8x128xf32> -> vector<8x128xf32>
    %c0_4 = arith.constant 0 : index
    %c0_5 = arith.constant 0 : index
    %5 = vector.load %arg4[%c0_4, %c0_5] : memref<1x128xf32, #tpu.memory_space<vmem>>, vector<1x128xf32>
    %6 = vector.broadcast %5 : vector<1x128xf32> to vector<8x128xf32>
    %7 = arith.addf %4, %6 : vector<8x128xf32>
    %cst_6 = arith.constant 0.000000e+00 : f32
    %8 = vector.broadcast %cst_6 : f32 to vector<8x128xf32>
    %9 = arith.maximumf %7, %8 : vector<8x128xf32>
    %10 = tpu.iota {dimensions = array<i32: 0>} : vector<8x128xi32>
    %11 = vector.broadcast %1 : i32 to vector<8x128xi32>
    %12 = arith.addi %10, %11 : vector<8x128xi32>
    %13 = tpu.iota {dimensions = array<i32: 1>} : vector<8x128xi32>
    %c128_i32 = arith.constant 128 : i32
    %14 = vector.broadcast %c128_i32 : i32 to vector<8x128xi32>
    %15 = arith.muli %12, %14 : vector<8x128xi32>
    %16 = arith.addi %15, %13 : vector<8x128xi32>
    %c-1640531527_i32 = arith.constant -1640531527 : i32
    %17 = arith.muli %0, %c-1640531527_i32 : i32
    %18 = vector.broadcast %17 : i32 to vector<8x128xi32>
    %19 = arith.addi %16, %18 : vector<8x128xi32>
    %c1_i32 = arith.constant 1 : i32
    %c-2048144789_i32 = arith.constant -2048144789 : i32
    %20 = arith.muli %c1_i32, %c-2048144789_i32 : i32
    %21 = vector.broadcast %20 : i32 to vector<8x128xi32>
    %22 = arith.addi %19, %21 : vector<8x128xi32>
    %c16_i32 = arith.constant 16 : i32
    %23 = vector.broadcast %c16_i32 : i32 to vector<8x128xi32>
    %24 = arith.shrui %22, %23 : vector<8x128xi32>
    %25 = arith.xori %22, %24 : vector<8x128xi32>
    %c2146121005_i32 = arith.constant 2146121005 : i32
    %26 = vector.broadcast %c2146121005_i32 : i32 to vector<8x128xi32>
    %27 = arith.muli %25, %26 : vector<8x128xi32>
    %c15_i32 = arith.constant 15 : i32
    %28 = vector.broadcast %c15_i32 : i32 to vector<8x128xi32>
    %29 = arith.shrui %27, %28 : vector<8x128xi32>
    %30 = arith.xori %27, %29 : vector<8x128xi32>
    %c-2073254261_i32 = arith.constant -2073254261 : i32
    %31 = vector.broadcast %c-2073254261_i32 : i32 to vector<8x128xi32>
    %32 = arith.muli %30, %31 : vector<8x128xi32>
    %c16_i32_7 = arith.constant 16 : i32
    %33 = vector.broadcast %c16_i32_7 : i32 to vector<8x128xi32>
    %34 = arith.shrui %32, %33 : vector<8x128xi32>
    %35 = arith.xori %32, %34 : vector<8x128xi32>
    %c-2147483648_i32 = arith.constant -2147483648 : i32
    %36 = vector.broadcast %c-2147483648_i32 : i32 to vector<8x128xi32>
    %37 = arith.cmpi ugt, %35, %36 : vector<8x128xi32>
    %cst_8 = arith.constant 2.000000e+00 : f32
    %38 = vector.broadcast %cst_8 : f32 to vector<8x128xf32>
    %39 = arith.mulf %9, %38 : vector<8x128xf32>
    %cst_9 = arith.constant 0.000000e+00 : f32
    %40 = vector.broadcast %cst_9 : f32 to vector<8x128xf32>
    %41 = arith.select %37, %39, %40 : vector<8x128xi1>, vector<8x128xf32>
    %42 = arith.truncf %41 : vector<8x128xf32> to vector<8x128xbf16>
    %c0_10 = arith.constant 0 : index
    %c0_11 = arith.constant 0 : index
    %43 = vector.load %arg5[%c0_10, %c0_11] : memref<128x128xbf16, #tpu.memory_space<vmem>>, vector<128x128xbf16>
    %cst_12 = arith.constant dense<0.000000e+00> : vector<8x128xf32>
    %44 = tpu.matmul %42, %43, %cst_12 {dimension_numbers = #tpu.dot_dimension_numbers<[1], [1], [0], [0], [0, 0, 1, 0], [], []>} : vector<8x128xbf16>, vector<128x128xbf16>, vector<8x128xf32> -> vector<8x128xf32>
    %c0_13 = arith.constant 0 : index
    %c0_14 = arith.constant 0 : index
    %45 = vector.load %arg6[%c0_13, %c0_14] : memref<1x128xf32, #tpu.memory_space<vmem>>, vector<1x128xf32>
    %46 = vector.broadcast %45 : vector<1x128xf32> to vector<8x128xf32>
    %47 = arith.addf %44, %46 : vector<8x128xf32>
    %cst_15 = arith.constant 0.000000e+00 : f32
    %48 = vector.broadcast %cst_15 : f32 to vector<8x128xf32>
    %49 = arith.maximumf %47, %48 : vector<8x128xf32>
    %50 = tpu.iota {dimensions = array<i32: 0>} : vector<8x128xi32>
    %51 = vector.broadcast %1 : i32 to vector<8x128xi32>
    %52 = arith.addi %50, %51 : vector<8x128xi32>
    %53 = tpu.iota {dimensions = array<i32: 1>} : vector<8x128xi32>
    %c128_i32_16 = arith.constant 128 : i32
    %54 = vector.broadcast %c128_i32_16 : i32 to vector<8x128xi32>
    %55 = arith.muli %52, %54 : vector<8x128xi32>
    %56 = arith.addi %55, %53 : vector<8x128xi32>
    %c-1640531527_i32_17 = arith.constant -1640531527 : i32
    %57 = arith.muli %0, %c-1640531527_i32_17 : i32
    %58 = vector.broadcast %57 : i32 to vector<8x128xi32>
    %59 = arith.addi %56, %58 : vector<8x128xi32>
    %c2_i32 = arith.constant 2 : i32
    %c-2048144789_i32_18 = arith.constant -2048144789 : i32
    %60 = arith.muli %c2_i32, %c-2048144789_i32_18 : i32
    %61 = vector.broadcast %60 : i32 to vector<8x128xi32>
    %62 = arith.addi %59, %61 : vector<8x128xi32>
    %c16_i32_19 = arith.constant 16 : i32
    %63 = vector.broadcast %c16_i32_19 : i32 to vector<8x128xi32>
    %64 = arith.shrui %62, %63 : vector<8x128xi32>
    %65 = arith.xori %62, %64 : vector<8x128xi32>
    %c2146121005_i32_20 = arith.constant 2146121005 : i32
    %66 = vector.broadcast %c2146121005_i32_20 : i32 to vector<8x128xi32>
    %67 = arith.muli %65, %66 : vector<8x128xi32>
    %c15_i32_21 = arith.constant 15 : i32
    %68 = vector.broadcast %c15_i32_21 : i32 to vector<8x128xi32>
    %69 = arith.shrui %67, %68 : vector<8x128xi32>
    %70 = arith.xori %67, %69 : vector<8x128xi32>
    %c-2073254261_i32_22 = arith.constant -2073254261 : i32
    %71 = vector.broadcast %c-2073254261_i32_22 : i32 to vector<8x128xi32>
    %72 = arith.muli %70, %71 : vector<8x128xi32>
    %c16_i32_23 = arith.constant 16 : i32
    %73 = vector.broadcast %c16_i32_23 : i32 to vector<8x128xi32>
    %74 = arith.shrui %72, %73 : vector<8x128xi32>
    %75 = arith.xori %72, %74 : vector<8x128xi32>
    %c-2147483648_i32_24 = arith.constant -2147483648 : i32
    %76 = vector.broadcast %c-2147483648_i32_24 : i32 to vector<8x128xi32>
    %77 = arith.cmpi ugt, %75, %76 : vector<8x128xi32>
    %cst_25 = arith.constant 2.000000e+00 : f32
    %78 = vector.broadcast %cst_25 : f32 to vector<8x128xf32>
    %79 = arith.mulf %49, %78 : vector<8x128xf32>
    %cst_26 = arith.constant 0.000000e+00 : f32
    %80 = vector.broadcast %cst_26 : f32 to vector<8x128xf32>
    %81 = arith.select %77, %79, %80 : vector<8x128xi1>, vector<8x128xf32>
    %82 = arith.truncf %81 : vector<8x128xf32> to vector<8x128xbf16>
    %c0_27 = arith.constant 0 : index
    %c0_28 = arith.constant 0 : index
    %83 = vector.load %arg7[%c0_27, %c0_28] : memref<128x128xbf16, #tpu.memory_space<vmem>>, vector<128x128xbf16>
    %cst_29 = arith.constant dense<0.000000e+00> : vector<8x128xf32>
    %84 = tpu.matmul %82, %83, %cst_29 {dimension_numbers = #tpu.dot_dimension_numbers<[1], [1], [0], [0], [0, 0, 1, 0], [], []>} : vector<8x128xbf16>, vector<128x128xbf16>, vector<8x128xf32> -> vector<8x128xf32>
    %c0_30 = arith.constant 0 : index
    %c0_31 = arith.constant 0 : index
    %85 = vector.load %arg8[%c0_30, %c0_31] : memref<1x128xf32, #tpu.memory_space<vmem>>, vector<1x128xf32>
    %86 = vector.broadcast %85 : vector<1x128xf32> to vector<8x128xf32>
    %87 = arith.addf %84, %86 : vector<8x128xf32>
    %c0_32 = arith.constant 0 : index
    %c0_33 = arith.constant 0 : index
    %88 = vector.load %arg9[%c0_32, %c0_33] : memref<8x128xf32, #tpu.memory_space<vmem>>, vector<8x128xf32>
    tpu.vector_store %arg9[%c0_32, %c0_33], %87 {strides = array<i32>} : memref<8x128xf32, #tpu.memory_space<vmem>>, vector<8x128xf32>,
    return
  }
  func.func @transform_0(%arg0: i32, %arg1: memref<1xi32, #tpu.memory_space<smem>>) -> (i32, i32) {
    %c0_i32 = arith.constant 0 : i32
    %c0_i32_0 = arith.constant 0 : i32
    return %arg0, %c0_i32 : i32, i32
  }
  func.func @transform_1(%arg0: i32, %arg1: memref<1xi32, #tpu.memory_space<smem>>) -> (i32, i32) {
    %c0_i32 = arith.constant 0 : i32
    %c0_i32_0 = arith.constant 0 : i32
    %c0_i32_1 = arith.constant 0 : i32
    return %c0_i32, %c0_i32_0 : i32, i32
  }
  func.func @transform_2(%arg0: i32, %arg1: memref<1xi32, #tpu.memory_space<smem>>) -> (i32, i32) {
    %c0_i32 = arith.constant 0 : i32
    %c0_i32_0 = arith.constant 0 : i32
    %c0_i32_1 = arith.constant 0 : i32
    return %c0_i32, %c0_i32_0 : i32, i32
  }
  func.func @transform_3(%arg0: i32, %arg1: memref<1xi32, #tpu.memory_space<smem>>) -> (i32, i32) {
    %c0_i32 = arith.constant 0 : i32
    %c0_i32_0 = arith.constant 0 : i32
    %c0_i32_1 = arith.constant 0 : i32
    return %c0_i32, %c0_i32_0 : i32, i32
  }
  func.func @transform_4(%arg0: i32, %arg1: memref<1xi32, #tpu.memory_space<smem>>) -> (i32, i32) {
    %c0_i32 = arith.constant 0 : i32
    %c0_i32_0 = arith.constant 0 : i32
    %c0_i32_1 = arith.constant 0 : i32
    return %c0_i32, %c0_i32_0 : i32, i32
  }
  func.func @transform_5(%arg0: i32, %arg1: memref<1xi32, #tpu.memory_space<smem>>) -> (i32, i32) {
    %c0_i32 = arith.constant 0 : i32
    %c0_i32_0 = arith.constant 0 : i32
    %c0_i32_1 = arith.constant 0 : i32
    return %c0_i32, %c0_i32_0 : i32, i32
  }
  func.func @transform_6(%arg0: i32, %arg1: memref<1xi32, #tpu.memory_space<smem>>) -> (i32, i32) {
    %c0_i32 = arith.constant 0 : i32
    %c0_i32_0 = arith.constant 0 : i32
    %c0_i32_1 = arith.constant 0 : i32
    return %c0_i32, %c0_i32_0 : i32, i32
  }
  func.func @transform_7(%arg0: i32, %arg1: memref<1xi32, #tpu.memory_space<smem>>) -> (i32, i32) {
    %c0_i32 = arith.constant 0 : i32
    %c0_i32_0 = arith.constant 0 : i32
    return %arg0, %c0_i32 : i32, i32
  }
}

</mosaic_0001>

<bundles_post_ra>
// kernel: tpu_custom_call.1
= control target key start
LH: loop header
LB: loop body
LE: loop exit
PB: predicated region body
PF: predicated region fallthrough
CT: control target
= control target key end

     0   :  { %14 = vsyncpa [#allocation5], 0  ;;  %s744_s0 = inlined_call_operand.<no memory space> [shape: s32[1], index: 0, kind: input, shape index: {}]   ;;  %s745_s1 = inlined_call_operand.hbm [shape: bf16[8,128], index: 1, kind: input, shape index: {}]   ;;  %s746_s2 = inlined_call_operand.hbm [shape: bf16[128,128], index: 2, kind: input, shape index: {}]   ;;  %s747_s3 = inlined_call_operand.vmem [shape: f32[1,128], index: 3, kind: input, shape index: {}]   ;;  %s748_s4 = inlined_call_operand.hbm [shape: bf16[128,128], index: 4, kind: input, shape index: {}]   ;;  %s749_s5 = inlined_call_operand.vmem [shape: f32[1,128], index: 5, kind: input, shape index: {}]   ;;  %s750_s6 = inlined_call_operand.hbm [shape: bf16[128,128], index: 6, kind: input, shape index: {}]   ;;  %s751_s7 = inlined_call_operand.vmem [shape: f32[1,128], index: 7, kind: input, shape index: {}]   ;;  %s752_s8 = inlined_call_operand.hbm [shape: f32[8,128], index: 8, kind: output, shape index: {}]  }
   0x1   :  { %15 = vsyncpa [#allocation8], 0 }
   0x2   :  { %16 = vsyncpa [#allocation11], 0  ;;  %s33_s29 = sshll.u32 %s746_s2, 4  ;;  %s34_s29 = int_to_ptr.hbm [resolvable:$true] %s33_s29 }
   0x3   :  { %17 = vsyncpa [#allocation6], 0  ;;  %s665_s30 = smov [#allocation7]   ;;  %s23_s12 = sshll.u32 %s745_s1, 4  ;;  %s24_s12 = int_to_ptr.hbm [resolvable:$true] %s23_s12 }
   0x4   :  { %s35_s9 = sshll.u32 %s665_s30, 4  ;;  %s666_s13 = smov 64   ;;  %s36_s9 = int_to_ptr.vmem [resolvable:$true] %s35_s9 }
   0x5   :  { %s667_s14 = smov 4   ;;  %s668_s15 = smov [#allocation4]  }
   0x6   :  { %41 = dma.hbm_to_vmem [thread:$0]  %s34_s29, 1024, %s36_s9, [#allocation8], %s666_s13, %s666_s13, %s667_s14  }
   0x7   :  { %s25_s16 = sshll.u32 %s668_s15, 4  ;;  %s48_s19 = sshll.u32 %s748_s4, 4  ;;  %s26_s16 = int_to_ptr.vmem [resolvable:$true] %s25_s16  ;;  %s49_s19 = int_to_ptr.hbm [resolvable:$true] %s48_s19 }
   0x8   :  { %28 = dma.hbm_to_vmem [thread:$0]  %s24_s12, 64, %s26_s16, [#allocation5]  }
   0x9   :  { %s63_s21 = sshll.u32 %s750_s6, 4  ;;  %s669_s22 = smov [#allocation9]   ;;  %s64_s21 = int_to_ptr.hbm [resolvable:$true] %s63_s21 }
   0xa   :  { %s50_s23 = sshll.u32 %s669_s22, 4  ;;  %s670_s1 = smov [#allocation10]   ;;  %s51_s23 = int_to_ptr.vmem [resolvable:$true] %s50_s23 }
   0xb   :  { %56 = dma.hbm_to_vmem [thread:$0]  %s49_s19, 1024, %s51_s23, [#allocation8], %s666_s13, %s666_s13, %s667_s14  }
   0xc   :  { %s65_s24 = sshll.u32 %s670_s1, 4  ;;  %s66_s24 = int_to_ptr.vmem [resolvable:$true] %s65_s24 }
   0xd   :  { %71 = dma.hbm_to_vmem [thread:$0]  %s64_s21, 1024, %s66_s24, [#allocation11], %s666_s13, %s666_s13, %s667_s14  }
   0xe   :  { %657 = dma.done.wait [#allocation5], 64  }
   0xf   :  { %658 = vsyncadd [#allocation5], 4294967232 }
  0x10   :  { %659 = dma.done.wait [#allocation8], 2048  }
  0x11   :  { %660 = vsyncadd [#allocation8], 4294965248 }
  0x12   :  { %661 = dma.done.wait [#allocation11], 1024  }
  0x13   :  { %662 = vsyncadd [#allocation11], 4294966272  ;;  %v510_v0 = vld [vmem:[#allocation7 + $0x38] sm:$0xff]  ;;  %v509_v1 = vld [vmem:[#allocation7 + $0x30] sm:$0xff]  ;;  %v175_v16 = vlaneseq  ;;  %s183_s25 = smul.u32 2654435769, %s744_s0 }
  0x14   :  { %161 = vmatpush.bf16.xpose.msra.mxu0 %v510_v0  ;;  %v508_v2 = vld [vmem:[#allocation7 + $0x28] sm:$0xff]  ;;  %v507_v3 = vld [vmem:[#allocation7 + $0x20] sm:$0xff]  ;;  %v506_v4 = vld [vmem:[#allocation7 + $0x18] sm:$0xff]  ;;  %s671_s30 = smov [#allocation12]  }
  0x15   :  { %v518_v5 = vld [vmem:[#allocation9 + $0x38] sm:$0xff]  ;;  %v505_v6 = vld [vmem:[#allocation7 + $0x10] sm:$0xff]  ;;  %v504_v8 = vld [vmem:[#allocation7 + $0x8] sm:$0xff]  ;;  %v176_v17 = vshrl.u32 %v175_v16, 7  ;;  %v180_v18 = vand.u32 127, %v175_v16  ;;  %v184_v21 = vstv %s183_s25  ;;  %s385_s9 = sshll.u32 %s671_s30, 4  ;;  %s386_s9 = int_to_ptr.vmem [resolvable:$true] %s385_s9 }
  0x16   :  { %269 = vmatpush.bf16.xpose.msra.mxu1 %v518_v5  ;;  %v517_v7 = vld [vmem:[#allocation9 + $0x30] sm:$0xff]  ;;  %v516_v9 = vld [vmem:[#allocation9 + $0x28] sm:$0xff]  ;;  %v503_v10 = vld [vmem:[#allocation7] sm:$0xff] }
  0x17   :  { %v515_v11 = vld [vmem:[#allocation9 + $0x20] sm:$0xff]  ;;  %v92_v12 = vld [vmem:[#allocation4] sm:$0xf]  ;;  %v513_v14 = vld [vmem:[#allocation9 + $0x10] sm:$0xff]  ;;  %v181_v19 = vmul.u32 128, %v176_v17 }
  0x18   :  { %v514_v13 = vld [vmem:[#allocation9 + $0x18] sm:$0xff]  ;;  %v512_v15 = vld [vmem:[#allocation9 + $0x8] sm:$0xff]  ;;  %v511_v25 = vld [vmem:[#allocation9] sm:$0xff] }
  0x19   :  { %v182_v20 = vadd.s32 %v181_v19, %v180_v18  ;;  %v526_v28 = vld [vmem:[#allocation10 + $0x38] sm:$0xff]  ;;  %v525_v31 = vld [vmem:[#allocation10 + $0x30] sm:$0xff]  ;;  %v524_v34 = vld [vmem:[#allocation10 + $0x28] sm:$0xff] }
  0x1a   :  { %366 = vmatpush.bf16.xpose.msra.mxu2 %v526_v28  ;;  %v534_v36 = vld [vmem:[%s747_s3] ss:$0 sm:$0xff]  ;;  %v523_v38 = vld [vmem:[#allocation10 + $0x20] sm:$0xff]  ;;  %v521_v46 = vld [vmem:[#allocation10 + $0x10] sm:$0xff] }
  0x1b   :  { %v185_v22 = vadd.s32 %v184_v21, %v182_v20  ;;  %v522_v44 = vld [vmem:[#allocation10 + $0x18] sm:$0xff]  ;;  %v520_v47 = vld [vmem:[#allocation10 + $0x8] sm:$0xff]  ;;  %v519_v50 = vld [vmem:[#allocation10] sm:$0xff] }
  0x1c   :  { %162 = vmatpush.bf16.xpose.msra.mxu0 %v509_v1  ;;  %v535_v58 = vld [vmem:[%s749_s5] ss:$0 sm:$0xff]  ;;  %s387_s5 = sshll.u32 %s752_s8, 4  ;;  %s388_s5 = int_to_ptr.hbm [resolvable:$true] %s387_s5 }
  0x1d   :  { %v186_v23 = vadd.s32 2246822507, %v185_v22  ;;  %v283_v48 = vadd.s32 198677718, %v185_v22 }
  0x1e   :  { %270 = vmatpush.bf16.xpose.msra.mxu1 %v517_v7 }
  0x1f   :  { %v187_v24 = vshrl.u32 %v186_v23, 16  ;;  %v284_v49 = vshrl.u32 %v283_v48, 16 }
  0x21   :  { %v188_v26 = vxor.u32 %v187_v24, %v186_v23  ;;  %v285_v51 = vxor.u32 %v284_v49, %v283_v48 }
  0x22   :  { %367 = vmatpush.bf16.xpose.msra.mxu2 %v525_v31 }
  0x23   :  { %v189_v27 = vmul.u32 2146121005, %v188_v26  ;;  %v286_v52 = vmul.u32 2146121005, %v285_v51 }
  0x24   :  { %163 = vmatpush.bf16.xpose.msra.mxu0 %v508_v2  ;;  %v536_v2 = vld [vmem:[%s751_s7] ss:$0 sm:$0xff] }
  0x25   :  { %v190_v29 = vshrl.u32 %v189_v27, 15  ;;  %v287_v53 = vshrl.u32 %v286_v52, 15 }
  0x26   :  { %271 = vmatpush.bf16.xpose.msra.mxu1 %v516_v9 }
  0x27   :  { %v191_v30 = vxor.u32 %v190_v29, %v189_v27  ;;  %v288_v54 = vxor.u32 %v287_v53, %v286_v52 }
  0x29   :  { %v192_v32 = vmul.u32 2221713035, %v191_v30  ;;  %v289_v55 = vmul.u32 2221713035, %v288_v54 }
  0x2a   :  { %368 = vmatpush.bf16.xpose.msra.mxu2 %v524_v34 }
  0x2b   :  { %v193_v33 = vshrl.u32 %v192_v32, 16  ;;  %v290_v56 = vshrl.u32 %v289_v55, 16 }
  0x2c   :  { %164 = vmatpush.bf16.xpose.msra.mxu0 %v507_v3 }
  0x2d   :  { %v194_v35 = vxor.u32 %v193_v33, %v192_v32  ;;  %v291_v57 = vxor.u32 %v290_v56, %v289_v55 }
  0x2e   :  { %272 = vmatpush.bf16.xpose.msra.mxu1 %v515_v11 }
  0x2f   :  { %v431_v37 = vxor.u32 2147483648, %v194_v35  ;;  %v467_v59 = vxor.u32 2147483648, %v291_v57 }
  0x31   :  { %vm197_vm0 = vcmp.gt.s32.totalorder %v431_v37, 0  ;;  %vm294_vm2 = vcmp.gt.s32.totalorder %v467_v59, 0 }
  0x32   :  { %369 = vmatpush.bf16.xpose.msra.mxu2 %v523_v38  ;;  %vm464_vm1 = vmpackc.low %vm197_vm0, %vm197_vm0 }
  0x33   :  { %vm500_vm3 = vmpackc.low %vm294_vm2, %vm294_vm2 }
  0x34   :  { %165 = vmatpush.bf16.xpose.msra.mxu0 %v506_v4 }
  0x36   :  { %273 = vmatpush.bf16.xpose.msra.mxu1 %v514_v13 }
  0x3a   :  { %370 = vmatpush.bf16.xpose.msra.mxu2 %v522_v44 }
  0x3c   :  { %166 = vmatpush.bf16.xpose.msra.mxu0 %v505_v6 }
  0x3e   :  { %274 = vmatpush.bf16.xpose.msra.mxu1 %v513_v14 }
  0x42   :  { %371 = vmatpush.bf16.xpose.msra.mxu2 %v521_v46 }
  0x44   :  { %167 = vmatpush.bf16.xpose.msra.mxu0 %v504_v8 }
  0x46   :  { %275 = vmatpush.bf16.xpose.msra.mxu1 %v512_v15 }
  0x4a   :  { %372 = vmatpush.bf16.xpose.msra.mxu2 %v520_v47 }
  0x4c   :  { %168 = vmatpush.bf16.xpose.msra.mxu0 %v503_v10 }
  0x4e   :  { %276 = vmatpush.bf16.xpose.msra.mxu1 %v511_v25 }
  0x52   :  { %373 = vmatpush.bf16.xpose.msra.mxu2 %v519_v50 }
  0x53   :  { %169 = vmatmul.bf16.vlgmr.msra.gmra.mxu0 %v92_v12 }
  0xd0   :  { %v170_v39 = vpop.f32.mrf.mxu0 }
  0xd1   :  { %v171_v40 = vadd.f32 %v534_v36, %v170_v39 }
  0xd3   :  { %v174_v41 = vmax.f32 %v171_v40, 0.0 }
  0xd5   :  { %v198_v42 = vmul.f32 2.0, %v174_v41 }
  0xd7   :  { %v465_v43 = vpack.c.bf16 %v198_v42, %v198_v42 }
  0xd8   :  { %v172_v45 = vpop.f32.mrf.mxu0 }
  0xd9   :  { %466 = vmatmul.msk.bf16.vlgmr.msra.gmra.mxu1 %vm464_vm1, %v465_v43 }
 0x156   :  { %v278_v60 = vpop.f32.mrf.mxu1 }
 0x157   :  { %v279_v61 = vadd.f32 %v535_v58, %v278_v60 }
 0x159   :  { %v282_v62 = vmax.f32 %v279_v61, 0.0 }
 0x15b   :  { %v295_v63 = vmul.f32 2.0, %v282_v62 }
 0x15d   :  { %v501_v0 = vpack.c.bf16 %v295_v63, %v295_v63 }
 0x15e   :  { %v280_v1 = vpop.f32.mrf.mxu1 }
 0x15f   :  { %502 = vmatmul.msk.bf16.vlgmr.msra.gmra.mxu2 %vm500_vm3, %v501_v0 }
 0x1e2   :  { %v375_v3 = vpop.f32.mrf.mxu2 }
 0x1e3   :  { %v376_v4 = vadd.f32 %v536_v2, %v375_v3 }
 0x1e5   :  { %379 = vst [vmem:[#allocation12] sm:$0xff] %v376_v4 }
 0x1e6   :  { %390 = dma.vmem_to_hbm [thread:$0]  %s386_s9, 128, %s388_s5, [#allocation6]  }
 0x1ea   :  { %v377_v5 = vpop.f32.mrf.mxu2 }
 0x1eb   :  { %663 = dma.done.wait [#allocation6], 128  }
 0x1ec   :  { %664 = vsyncadd [#allocation6], 4294967168 }
 0x1ed   :  { %395 = vsyncpa [#allocation5], 1 }
 0x1ee   :  { %396 = vsyncpa [#allocation8], 1 }
 0x1ef   :  { %397 = vsyncpa [#allocation11], 1 }
 0x1f0   :  { %398 = vsyncpa [#allocation6], 1 }

</bundles_post_ra>
